<compile_context>
chip_gen: v7x
topology: tpu7x:2x2x1
jax: 0.10.0
libtpu: 0.0.40
codegen_flags: <defaults>
</compile_context>

<pallas_src>
import jax
import jax.numpy as jnp
from jax.experimental import pallas as pl
from jax.experimental.pallas import tpu as pltpu

# ---- model hyperparameters (from the PyTorch module) ----
EMBED_SIZE = 100
HIDDEN_SIZE = 256
OUTPUT_SIZE = 2
VOCAB_SIZE = 50          # synthetic small vocab (GloVe not loaded; embeddings are random)

# ---- example shapes ----
BATCH = 2
SEQ_LEN = 8

# ---- TPU-friendly padded sizes ----
E_PAD = 128              # lane-align embedding dim (100 -> 128)
V_PAD = 64               # sublane-align vocab for the one-hot gather (50 -> 64)
B_PAD = 8                # fp32 sublane-align batch (2 -> 8)
O_PAD = 128              # lane-dense output (2 -> 128)


def text_classification_forward(token_ids, params):
    """token_ids: (B, T) int32. Returns (B, OUTPUT_SIZE) float32 logits."""
    B, T = token_ids.shape
    H = HIDDEN_SIZE

    # ---------- wrapper-side padding / packing (all tiny, one-time) ----------
    # Frozen embedding table, zero-padded to (V_PAD, E_PAD).
    emb = jnp.zeros((V_PAD, E_PAD), jnp.float32).at[:VOCAB_SIZE, :EMBED_SIZE].set(
        params["embedding"])
    # W_ih^T zero-padded along E (padded x columns are zero so they contribute nothing).
    w_ih = jnp.zeros((E_PAD, H), jnp.float32).at[:EMBED_SIZE, :].set(params["w_ih_t"])
    w_hh = params["w_hh_t"]                                           # (H, H)
    # Pre-folded RNN bias.
    b_rnn = (params["b_ih"] + params["b_hh"]).reshape(1, H)           # (1, H)
    # FC head padded to lane-dense output.
    w_fc = jnp.zeros((H, O_PAD), jnp.float32).at[:, :OUTPUT_SIZE].set(params["w_fc_t"])
    b_fc = jnp.zeros((1, O_PAD), jnp.float32).at[:, :OUTPUT_SIZE].set(
        params["b_fc"].reshape(1, -1))

    # Token ids: pad batch to B_PAD (pad rows use id 0; their logits are sliced off),
    # go time-major and flatten to a (T*B_PAD, 1) column for the in-kernel one-hot.
    ids_pad = jnp.zeros((B_PAD, T), jnp.int32).at[:B, :].set(token_ids)
    ids_col = jnp.transpose(ids_pad, (1, 0)).reshape(T * B_PAD, 1)    # (T*Bp, 1)

    # ---------- kernel (single invocation, everything resident in VMEM) ----------
    def kernel(ids_ref, emb_ref, wih_ref, whh_ref, b_ref, wfc_ref, bfc_ref, out_ref):
        # 1) Fused embedding gather as a one-hot matmul on the MXU.
        ids = ids_ref[...]                                            # (T*Bp, 1) int32
        iota_v = jax.lax.broadcasted_iota(jnp.int32, (T * B_PAD, V_PAD), 1)
        onehot = (iota_v == ids).astype(jnp.float32)                  # (T*Bp, Vp)
        x = jnp.dot(onehot, emb_ref[...],
                    preferred_element_type=jnp.float32)               # (T*Bp, Ep)

        # 2) Hoisted input projection: one matmul + pre-folded bias.
        xproj = (jnp.dot(x, wih_ref[...], preferred_element_type=jnp.float32)
                 + b_ref[...])                                        # (T*Bp, H)

        # 3) Serial tanh recurrence (latency-bound path: one (Bp,H)@(H,H) per step).
        whh = whh_ref[...]
        h = jnp.zeros((B_PAD, H), jnp.float32)
        for t in range(T):  # static unroll (T = 8 at trace time)
            pre = xproj[t * B_PAD:(t + 1) * B_PAD, :] + jnp.dot(
                h, whh, preferred_element_type=jnp.float32)
            h = jnp.tanh(pre)

        # 4) FC head on the last hidden state, lane-dense padded output.
        out_ref[...] = (jnp.dot(h, wfc_ref[...], preferred_element_type=jnp.float32)
                        + bfc_ref[...])

    vmem = pl.BlockSpec(memory_space=pltpu.MemorySpace.VMEM)
    out_pad = pl.pallas_call(
        kernel,
        out_shape=jax.ShapeDtypeStruct((B_PAD, O_PAD), jnp.float32),
        in_specs=[vmem] * 7,
        out_specs=vmem,
    )(ids_col, emb, w_ih, w_hh, b_rnn, w_fc, b_fc)

    return out_pad[:B, :OUTPUT_SIZE]


def init_params(key):
    """Deterministic synthetic parameters with the module's shapes."""
    ks = jax.random.split(key, 7)
    k = 1.0 / jnp.sqrt(HIDDEN_SIZE)
    params = {
        # Frozen "pretrained" embeddings (GloVe replaced by a random table).
        "embedding": jax.random.normal(ks[0], (VOCAB_SIZE, EMBED_SIZE), jnp.float32),
        # nn.RNN weights, stored pre-transposed for the kernel.
        "w_ih_t": jax.random.uniform(ks[1], (EMBED_SIZE, HIDDEN_SIZE), jnp.float32, -k, k),
        "w_hh_t": jax.random.uniform(ks[2], (HIDDEN_SIZE, HIDDEN_SIZE), jnp.float32, -k, k),
        "b_ih": jax.random.uniform(ks[3], (HIDDEN_SIZE,), jnp.float32, -k, k),
        "b_hh": jax.random.uniform(ks[4], (HIDDEN_SIZE,), jnp.float32, -k, k),
        # nn.Linear(hidden_size, output_size), pre-transposed.
        "w_fc_t": jax.random.uniform(ks[5], (HIDDEN_SIZE, OUTPUT_SIZE), jnp.float32, -k, k),
        "b_fc": jax.random.uniform(ks[6], (OUTPUT_SIZE,), jnp.float32, -k, k),
    }
    return params


if __name__ == "__main__":
    key = jax.random.PRNGKey(0)
    pkey, xkey = jax.random.split(key)
    params = init_params(pkey)

    token_ids = jax.random.randint(xkey, (BATCH, SEQ_LEN), 0, VOCAB_SIZE, dtype=jnp.int32)

    logits = text_classification_forward(token_ids, params)
    logits = jax.block_until_ready(logits)

    assert logits.shape == (BATCH, OUTPUT_SIZE)
    assert logits.dtype == jnp.float32

    # Pure-JAX reference of embedding -> RNN(tanh) -> fc(last hidden).
    def ref_forward(ids, p):
        x = p["embedding"][ids]                      # (B, T, E)
        h = jnp.zeros((ids.shape[0], HIDDEN_SIZE), jnp.float32)
        for t in range(ids.shape[1]):
            h = jnp.tanh(x[:, t, :] @ p["w_ih_t"] + p["b_ih"]
                         + h @ p["w_hh_t"] + p["b_hh"])
        return h @ p["w_fc_t"] + p["b_fc"]

    ref = ref_forward(token_ids, params)
    assert jnp.allclose(logits, ref, atol=1e-4, rtol=1e-4), (logits, ref)

    print("KERNEL_OK")
</pallas_src>

<mosaic_0001>
module attributes {stable_mosaic.version = 11 : i64} {
  func.func @kernel(%arg0: memref<64x1xi32, #tpu.memory_space<vmem>>, %arg1: memref<64x128xf32, #tpu.memory_space<vmem>>, %arg2: memref<128x256xf32, #tpu.memory_space<vmem>>, %arg3: memref<256x256xf32, #tpu.memory_space<vmem>>, %arg4: memref<1x256xf32, #tpu.memory_space<vmem>>, %arg5: memref<256x128xf32, #tpu.memory_space<vmem>>, %arg6: memref<1x128xf32, #tpu.memory_space<vmem>>, %arg7: memref<8x128xf32, #tpu.memory_space<vmem>>) attributes {dimension_semantics = [], scalar_prefetch = 0 : i64, scratch_operands = 0 : i64, tpu.core_type = #tpu.core_type<tc>} {
    %c0 = arith.constant 0 : index
    %c0_0 = arith.constant 0 : index
    %0 = vector.load %arg0[%c0, %c0_0] : memref<64x1xi32, #tpu.memory_space<vmem>>, vector<64x1xi32>
    %1 = tpu.iota {dimensions = array<i32: 1>} : vector<64x64xi32>
    %2 = vector.broadcast %0 : vector<64x1xi32> to vector<64x64xi32>
    %3 = arith.cmpi eq, %1, %2 : vector<64x64xi32>
    %4 = arith.extui %3 : vector<64x64xi1> to vector<64x64xi32>
    %5 = arith.sitofp %4 : vector<64x64xi32> to vector<64x64xf32>
    %c0_1 = arith.constant 0 : index
    %c0_2 = arith.constant 0 : index
    %6 = vector.load %arg1[%c0_1, %c0_2] : memref<64x128xf32, #tpu.memory_space<vmem>>, vector<64x128xf32>
    %cst = arith.constant dense<0.000000e+00> : vector<64x128xf32>
    %7 = tpu.matmul %5, %6, %cst {dimension_numbers = #tpu.dot_dimension_numbers<[1], [0], [0], [1], [0, 0, 1, 1], [], []>} : vector<64x64xf32>, vector<64x128xf32>, vector<64x128xf32> -> vector<64x128xf32>
    %c0_3 = arith.constant 0 : index
    %c0_4 = arith.constant 0 : index
    %8 = vector.load %arg2[%c0_3, %c0_4] : memref<128x256xf32, #tpu.memory_space<vmem>>, vector<128x256xf32>
    %cst_5 = arith.constant dense<0.000000e+00> : vector<64x256xf32>
    %9 = tpu.matmul %7, %8, %cst_5 {dimension_numbers = #tpu.dot_dimension_numbers<[1], [0], [0], [1], [0, 0, 1, 1], [], []>} : vector<64x128xf32>, vector<128x256xf32>, vector<64x256xf32> -> vector<64x256xf32>
    %c0_6 = arith.constant 0 : index
    %c0_7 = arith.constant 0 : index
    %10 = vector.load %arg4[%c0_6, %c0_7] : memref<1x256xf32, #tpu.memory_space<vmem>>, vector<1x256xf32>
    %11 = vector.broadcast %10 : vector<1x256xf32> to vector<64x256xf32>
    %12 = arith.addf %9, %11 : vector<64x256xf32>
    %c0_8 = arith.constant 0 : index
    %c0_9 = arith.constant 0 : index
    %13 = vector.load %arg3[%c0_8, %c0_9] : memref<256x256xf32, #tpu.memory_space<vmem>>, vector<256x256xf32>
    %cst_10 = arith.constant 0.000000e+00 : f32
    %14 = vector.broadcast %cst_10 : f32 to vector<8x256xf32>
    %15 = vector.extract_strided_slice %12 {offsets = [0, 0], sizes = [8, 256], strides = [1, 1]} : vector<64x256xf32> to vector<8x256xf32>
    %cst_11 = arith.constant dense<0.000000e+00> : vector<8x256xf32>
    %16 = tpu.matmul %14, %13, %cst_11 {dimension_numbers = #tpu.dot_dimension_numbers<[1], [0], [0], [1], [0, 0, 1, 1], [], []>} : vector<8x256xf32>, vector<256x256xf32>, vector<8x256xf32> -> vector<8x256xf32>
    %17 = arith.addf %15, %16 : vector<8x256xf32>
    %18 = math.tanh %17 : vector<8x256xf32>
    %19 = vector.extract_strided_slice %12 {offsets = [8, 0], sizes = [8, 256], strides = [1, 1]} : vector<64x256xf32> to vector<8x256xf32>
    %cst_12 = arith.constant dense<0.000000e+00> : vector<8x256xf32>
    %20 = tpu.matmul %18, %13, %cst_12 {dimension_numbers = #tpu.dot_dimension_numbers<[1], [0], [0], [1], [0, 0, 1, 1], [], []>} : vector<8x256xf32>, vector<256x256xf32>, vector<8x256xf32> -> vector<8x256xf32>
    %21 = arith.addf %19, %20 : vector<8x256xf32>
    %22 = math.tanh %21 : vector<8x256xf32>
    %23 = vector.extract_strided_slice %12 {offsets = [16, 0], sizes = [8, 256], strides = [1, 1]} : vector<64x256xf32> to vector<8x256xf32>
    %cst_13 = arith.constant dense<0.000000e+00> : vector<8x256xf32>
    %24 = tpu.matmul %22, %13, %cst_13 {dimension_numbers = #tpu.dot_dimension_numbers<[1], [0], [0], [1], [0, 0, 1, 1], [], []>} : vector<8x256xf32>, vector<256x256xf32>, vector<8x256xf32> -> vector<8x256xf32>
    %25 = arith.addf %23, %24 : vector<8x256xf32>
    %26 = math.tanh %25 : vector<8x256xf32>
    %27 = vector.extract_strided_slice %12 {offsets = [24, 0], sizes = [8, 256], strides = [1, 1]} : vector<64x256xf32> to vector<8x256xf32>
    %cst_14 = arith.constant dense<0.000000e+00> : vector<8x256xf32>
    %28 = tpu.matmul %26, %13, %cst_14 {dimension_numbers = #tpu.dot_dimension_numbers<[1], [0], [0], [1], [0, 0, 1, 1], [], []>} : vector<8x256xf32>, vector<256x256xf32>, vector<8x256xf32> -> vector<8x256xf32>
    %29 = arith.addf %27, %28 : vector<8x256xf32>
    %30 = math.tanh %29 : vector<8x256xf32>
    %31 = vector.extract_strided_slice %12 {offsets = [32, 0], sizes = [8, 256], strides = [1, 1]} : vector<64x256xf32> to vector<8x256xf32>
    %cst_15 = arith.constant dense<0.000000e+00> : vector<8x256xf32>
    %32 = tpu.matmul %30, %13, %cst_15 {dimension_numbers = #tpu.dot_dimension_numbers<[1], [0], [0], [1], [0, 0, 1, 1], [], []>} : vector<8x256xf32>, vector<256x256xf32>, vector<8x256xf32> -> vector<8x256xf32>
    %33 = arith.addf %31, %32 : vector<8x256xf32>
    %34 = math.tanh %33 : vector<8x256xf32>
    %35 = vector.extract_strided_slice %12 {offsets = [40, 0], sizes = [8, 256], strides = [1, 1]} : vector<64x256xf32> to vector<8x256xf32>
    %cst_16 = arith.constant dense<0.000000e+00> : vector<8x256xf32>
    %36 = tpu.matmul %34, %13, %cst_16 {dimension_numbers = #tpu.dot_dimension_numbers<[1], [0], [0], [1], [0, 0, 1, 1], [], []>} : vector<8x256xf32>, vector<256x256xf32>, vector<8x256xf32> -> vector<8x256xf32>
    %37 = arith.addf %35, %36 : vector<8x256xf32>
    %38 = math.tanh %37 : vector<8x256xf32>
    %39 = vector.extract_strided_slice %12 {offsets = [48, 0], sizes = [8, 256], strides = [1, 1]} : vector<64x256xf32> to vector<8x256xf32>
    %cst_17 = arith.constant dense<0.000000e+00> : vector<8x256xf32>
    %40 = tpu.matmul %38, %13, %cst_17 {dimension_numbers = #tpu.dot_dimension_numbers<[1], [0], [0], [1], [0, 0, 1, 1], [], []>} : vector<8x256xf32>, vector<256x256xf32>, vector<8x256xf32> -> vector<8x256xf32>
    %41 = arith.addf %39, %40 : vector<8x256xf32>
    %42 = math.tanh %41 : vector<8x256xf32>
    %43 = vector.extract_strided_slice %12 {offsets = [56, 0], sizes = [8, 256], strides = [1, 1]} : vector<64x256xf32> to vector<8x256xf32>
    %cst_18 = arith.constant dense<0.000000e+00> : vector<8x256xf32>
    %44 = tpu.matmul %42, %13, %cst_18 {dimension_numbers = #tpu.dot_dimension_numbers<[1], [0], [0], [1], [0, 0, 1, 1], [], []>} : vector<8x256xf32>, vector<256x256xf32>, vector<8x256xf32> -> vector<8x256xf32>
    %45 = arith.addf %43, %44 : vector<8x256xf32>
    %46 = math.tanh %45 : vector<8x256xf32>
    %c0_19 = arith.constant 0 : index
    %c0_20 = arith.constant 0 : index
    %47 = vector.load %arg5[%c0_19, %c0_20] : memref<256x128xf32, #tpu.memory_space<vmem>>, vector<256x128xf32>
    %cst_21 = arith.constant dense<0.000000e+00> : vector<8x128xf32>
    %48 = tpu.matmul %46, %47, %cst_21 {dimension_numbers = #tpu.dot_dimension_numbers<[1], [0], [0], [1], [0, 0, 1, 1], [], []>} : vector<8x256xf32>, vector<256x128xf32>, vector<8x128xf32> -> vector<8x128xf32>
    %c0_22 = arith.constant 0 : index
    %c0_23 = arith.constant 0 : index
    %49 = vector.load %arg6[%c0_22, %c0_23] : memref<1x128xf32, #tpu.memory_space<vmem>>, vector<1x128xf32>
    %50 = vector.broadcast %49 : vector<1x128xf32> to vector<8x128xf32>
    %51 = arith.addf %48, %50 : vector<8x128xf32>
    %c0_24 = arith.constant 0 : index
    %c0_25 = arith.constant 0 : index
    %52 = vector.load %arg7[%c0_24, %c0_25] : memref<8x128xf32, #tpu.memory_space<vmem>>, vector<8x128xf32>
    tpu.vector_store %arg7[%c0_24, %c0_25], %51 {strides = array<i32>} : memref<8x128xf32, #tpu.memory_space<vmem>>, vector<8x128xf32>,
    return
  }
}

</mosaic_0001>

<bundles_post_ra>
// kernel: tpu_custom_call.1
= control target key start
LH: loop header
LB: loop body
LE: loop exit
PB: predicated region body
PF: predicated region fallthrough
CT: control target
= control target key end

     0   :  { %12 = vsyncpa [#allocation3], 0  ;;  %s2618_s0 = inlined_call_operand.vmem [shape: s32[64,1], index: 0, kind: input, shape index: {}]   ;;  %s2619_s1 = inlined_call_operand.vmem [shape: f32[64,128], index: 1, kind: input, shape index: {}]   ;;  %s2620_s2 = inlined_call_operand.hbm [shape: f32[128,256], index: 2, kind: input, shape index: {}]   ;;  %s2621_s3 = inlined_call_operand.hbm [shape: f32[256,256], index: 3, kind: input, shape index: {}]   ;;  %s2622_s4 = inlined_call_operand.vmem [shape: f32[1,256], index: 4, kind: input, shape index: {}]   ;;  %s2623_s5 = inlined_call_operand.hbm [shape: f32[256,128], index: 5, kind: input, shape index: {}]   ;;  %s2624_s6 = inlined_call_operand.vmem [shape: f32[1,128], index: 6, kind: input, shape index: {}]   ;;  %s2625_s7 = inlined_call_operand.hbm [shape: f32[8,128], index: 7, kind: output, shape index: {}]  }
   0x1   :  { %13 = vsyncpa [#allocation6], 0 }
   0x2   :  { %14 = vsyncpa [#allocation4], 0  ;;  %s2069_s24 = smov [#allocation5]   ;;  %s2070_s26 = smov [#allocation2]  }
   0x3   :  { %s36_s25 = sshll.u32 %s2069_s24, 4  ;;  %s24_s27 = sshll.u32 %s2070_s26, 4  ;;  %s37_s25 = int_to_ptr.vmem [resolvable:$true] %s36_s25  ;;  %s2119_s27 = int_to_ptr.vmem [resolvable:$true] %s24_s27 }
   0x4   :  { %s1975_s30 = scalar_lea.hbm %s2621_s3, 8192 }
   0x5   :  { %p1976_p0 = scmp.ne.s32.totalorder %s2621_s3, %s1975_s30  ;;  %p1979_p1 = scmp.lt.u32.totalorder %s1975_s30, %s2621_s3 }
   0x7   :  { %p1981_p2 = pnand %p1979_p1, %p1976_p0 }
   0x9   :  { %1984 = shalt.err (!%p1981_p2)
}
   0xa   :  { %s1985_s12 = scalar_lea.vmem %s37_s25, 8192  ;;  %p1990_p4 = scmp.lt.s32.totalorder %s37_s25, %s37_s25 }
   0xb   :  { %p1986_p3 = scmp.ne.s32.totalorder %s37_s25, %s1985_s12  ;;  %p1991_p5 = scmp.lt.s32.totalorder %s1985_s12, %s1985_s12 }
   0xd   :  { %p1992_p6 = por %p1991_p5, %p1990_p4 }
   0xf   :  { %p1993_p7 = pnand %p1992_p6, %p1986_p3 }
  0x11   :  { %1996 = shalt.err (!%p1993_p7)
}
  0x12   :  { %s2071_s13 = smov 256   ;;  %s2072_s14 = smov 16  }
  0x13   :  { %42 = dma.hbm_to_vmem [thread:$0]  %s2621_s3, 8192, %s37_s25, [#allocation6], %s2071_s13, %s2071_s13, %s2072_s14  }
  0x14   :  { %s1997_s19 = scalar_lea.hbm %s2620_s2, 4096 }
  0x15   :  { %p1998_p8 = scmp.ne.s32.totalorder %s2620_s2, %s1997_s19  ;;  %p2001_p9 = scmp.lt.u32.totalorder %s1997_s19, %s2620_s2 }
  0x17   :  { %p2003_p10 = pnand %p2001_p9, %p1998_p8 }
  0x19   :  { %2006 = shalt.err (!%p2003_p10)
}
  0x1a   :  { %s2007_s24 = scalar_lea.vmem %s2119_s27, 4096  ;;  %p2012_p12 = scmp.lt.s32.totalorder %s2119_s27, %s2119_s27 }
  0x1b   :  { %p2008_p11 = scmp.ne.s32.totalorder %s2119_s27, %s2007_s24  ;;  %p2013_p13 = scmp.lt.s32.totalorder %s2007_s24, %s2007_s24 }
  0x1d   :  { %p2014_p0 = por %p2013_p13, %p2012_p12 }
  0x1f   :  { %p2015_p1 = pnand %p2014_p0, %p2008_p11 }
  0x21   :  { %2018 = shalt.err (!%p2015_p1)
}
  0x22   :  { %30 = dma.hbm_to_vmem [thread:$0]  %s2620_s2, 4096, %s2119_s27, [#allocation3], %s2071_s13, %s2071_s13, %s2072_s14  }
  0x23   :  { %s2073_s26 = smov [#allocation7]   ;;  %s2019_s8 = scalar_lea.hbm %s2623_s5, 4096 }
  0x24   :  { %s50_s28 = sshll.u32 %s2073_s26, 4  ;;  %p2020_p2 = scmp.ne.s32.totalorder %s2623_s5, %s2019_s8  ;;  %s51_s28 = int_to_ptr.vmem [resolvable:$true] %s50_s28 }
  0x25   :  { %p2023_p3 = scmp.lt.u32.totalorder %s2019_s8, %s2623_s5 }
  0x27   :  { %p2025_p4 = pnand %p2023_p3, %p2020_p2 }
  0x29   :  { %2028 = shalt.err (!%p2025_p4)
}
  0x2a   :  { %s2029_s15 = scalar_lea.vmem %s51_s28, 4096  ;;  %p2034_p6 = scmp.lt.s32.totalorder %s51_s28, %s51_s28 }
  0x2b   :  { %p2030_p5 = scmp.ne.s32.totalorder %s51_s28, %s2029_s15  ;;  %p2035_p7 = scmp.lt.s32.totalorder %s2029_s15, %s2029_s15 }
  0x2d   :  { %p2036_p8 = por %p2035_p7, %p2034_p6 }
  0x2f   :  { %p2037_p9 = pnand %p2036_p8, %p2030_p5 }
  0x31   :  { %2040 = shalt.err (!%p2037_p9)
}
  0x32   :  { %s2074_s2 = smov 128   ;;  %s2075_s27 = smov 8  }
  0x33   :  { %56 = dma.hbm_to_vmem [thread:$0]  %s2623_s5, 4096, %s51_s28, [#allocation6], %s2074_s2, %s2074_s2, %s2075_s27  }
  0x34   :  { %2063 = dma.done.wait [#allocation3], 4096  }
  0x35   :  { %2064 = vsyncadd [#allocation3], 4294963200 }
  0x36   :  { %2065 = dma.done.wait [#allocation6], 12288  }
  0x37   :  { %2066 = vsyncadd [#allocation6], 4294955008  ;;  %v2076_v0 = vmov 0   ;;  %v68_v1 = vld [vmem:[%s2618_s0] sm:$0xff]  ;;  %v70_v2 = vld [vmem:[%s2618_s0 + $0x10] sm:$0xff]  ;;  %v2077_v7 = vmov 0.0  }
  0x38   :  { %1941 = vset.pattern.permute.xlu0 %v2076_v0  ;;  %1942 = vset.pattern.permute.xlu1 %v2076_v0  ;;  %v69_v3 = vld [vmem:[%s2618_s0 + $0x8] sm:$0xff]  ;;  %v71_v4 = vld [vmem:[%s2618_s0 + $0x18] sm:$0xff]  ;;  %v126_v5 = vld [vmem:[%s2619_s1] sm:$0xff]  ;;  %vm134_vm0 = vcmask 523264   ;;  %s2078_s22 = smov [#allocation8]  }
  0x39   :  { %79 = vperm.xlu0 %1941, %v68_v1   ;;  %85 = vperm.xlu1 %1942, %v70_v2   ;;  %v127_v6 = vld [vmem:[%s2619_s1 + $0x8] sm:$0xff]  ;;  %v128_v9 = vld [vmem:[%s2619_s1 + $0x10] sm:$0xff]  ;;  %v129_v10 = vld [vmem:[%s2619_s1 + $0x18] sm:$0xff]  ;;  %s1201_s23 = sshll.u32 %s2078_s22, 4  ;;  %s1202_s23 = int_to_ptr.vmem [resolvable:$true] %s1201_s23 }
  0x3a   :  { %372 = vmatprep.mubr.f32.mxu1 %v2077_v7  ;;  %v1307_v8 = vpack.c.bf16 %v127_v6, %v126_v5  ;;  %v1311_v11 = vpack.c.bf16 %v129_v10, %v128_v9  ;;  %v130_v12 = vld [vmem:[%s2619_s1 + $0x20] sm:$0xff]  ;;  %v131_v13 = vld [vmem:[%s2619_s1 + $0x28] sm:$0xff]  ;;  %v132_v17 = vld [vmem:[%s2619_s1 + $0x30] sm:$0xff]  ;;  %v76_v10 = vlaneseq  ;;  %s2041_s24 = scalar_lea.vmem %s1202_s23, 128  ;;  %p2046_p11 = scmp.lt.s32.totalorder %s1202_s23, %s1202_s23 }
  0x3b   :  { %v72_v14 = vld [vmem:[%s2618_s0 + $0x20] sm:$0xff]  ;;  %v73_v15 = vld [vmem:[%s2618_s0 + $0x28] sm:$0xff]  ;;  %v1315_v16 = vpack.c.bf16 %v131_v13, %v130_v12  ;;  %v133_v18 = vld [vmem:[%s2619_s1 + $0x38] sm:$0xff]  ;;  %p2042_p10 = scmp.ne.s32.totalorder %s1202_s23, %s2041_s24  ;;  %p2047_p12 = scmp.lt.s32.totalorder %s2041_s24, %s2041_s24 }
  0x3c   :  { %1308 = vmatprep.subr.bf16.mxu0 %v1307_v8  ;;  %v74_v19 = vld [vmem:[%s2618_s0 + $0x30] sm:$0xff]  ;;  %v1319_v20 = vpack.c.bf16 %v133_v18, %v132_v17  ;;  %v75_v21 = vld [vmem:[%s2618_s0 + $0x38] sm:$0xff]  ;;  %v422_v22 = vld [vmem:[#allocation5 + $0x8] sm:$0xff] }
  0x3d   :  { %82 = vperm.xlu0 %1941, %v69_v3   ;;  %88 = vperm.xlu1 %1942, %v71_v4   ;;  %v424_v23 = vld [vmem:[#allocation5 + $0x18] sm:$0xff]  ;;  %v265_v25 = vld [vmem:[#allocation2 + $0x8] sm:$0xff]  ;;  %v264_v27 = vld [vmem:[#allocation2] sm:$0xff]  ;;  %p2048_p13 = por %p2047_p12, %p2046_p11 }
  0x3e   :  { %1310 = vmatpush3.bf16.msra.mxu0 %v1307_v8  ;;  %v2211_v24 = vpack.c.bf16 %v424_v23, %v422_v22  ;;  %v267_v26 = vld [vmem:[#allocation2 + $0x18] sm:$0xff]  ;;  %v266_v29 = vld [vmem:[#allocation2 + $0x10] sm:$0xff]  ;;  %v269_v31 = vld [vmem:[#allocation2 + $0x28] sm:$0xff] }
  0x3f   :  { %1312 = vmatprep.subr.bf16.mxu0 %v1311_v11  ;;  %v1323_v28 = vpack.c.bf16 %v267_v26, %v265_v25  ;;  %v1325_v30 = vpack.c.bf16 %v266_v29, %v264_v27  ;;  %v271_v32 = vld [vmem:[#allocation2 + $0x38] sm:$0xff]  ;;  %v268_v33 = vld [vmem:[#allocation2 + $0x20] sm:$0xff]  ;;  %v270_v35 = vld [vmem:[#allocation2 + $0x30] sm:$0xff]  ;;  %p2049_p0 = pnand %p2048_p13, %p2042_p10 }
  0x40   :  { %v1327_v34 = vpack.c.bf16 %v271_v32, %v269_v31  ;;  %v1329_v36 = vpack.c.bf16 %v270_v35, %v268_v33  ;;  %v273_v37 = vld [vmem:[#allocation2 + $0x48] sm:$0xff]  ;;  %v275_v38 = vld [vmem:[#allocation2 + $0x58] sm:$0xff]  ;;  %v272_v39 = vld [vmem:[#allocation2 + $0x40] sm:$0xff] }
  0x41   :  { %91 = vperm.xlu0 %1941, %v72_v14   ;;  %94 = vperm.xlu1 %1942, %v73_v15   ;;  %v1331_v40 = vpack.c.bf16 %v275_v38, %v273_v37  ;;  %v274_v41 = vld [vmem:[#allocation2 + $0x50] sm:$0xff]  ;;  %v277_v43 = vld [vmem:[#allocation2 + $0x68] sm:$0xff]  ;;  %v279_v44 = vld [vmem:[#allocation2 + $0x78] sm:$0xff] }
  0x42   :  { %1314 = vmatpush3.bf16.msra.mxu0 %v1311_v11  ;;  %1324 = vmatprep.subr.bf16.mxu1 %v1323_v28  ;;  %v1333_v42 = vpack.c.bf16 %v274_v41, %v272_v39  ;;  %v276_v45 = vld [vmem:[#allocation2 + $0x60] sm:$0xff]  ;;  %v1335_v46 = vpack.c.bf16 %v279_v44, %v277_v43  ;;  %v278_v47 = vld [vmem:[#allocation2 + $0x70] sm:$0xff]  ;;  %v281_v49 = vld [vmem:[#allocation2 + $0x88] sm:$0xff]  ;;  %v2216_v11 = vand.u32 127, %v76_v10 }
  0x43   :  { %1316 = vmatprep.subr.bf16.mxu0 %v1315_v16  ;;  %1326 = vmatpush1.bf16.msra.mxu1 %v1325_v30  ;;  %v1337_v48 = vpack.c.bf16 %v278_v47, %v276_v45  ;;  %v283_v50 = vld [vmem:[#allocation2 + $0x98] sm:$0xff]  ;;  %v280_v51 = vld [vmem:[#allocation2 + $0x80] sm:$0xff]  ;;  %v282_v53 = vld [vmem:[#allocation2 + $0x90] sm:$0xff] }
  0x44   :  { %1328 = vmatprep.subr.bf16.mxu1 %v1327_v34  ;;  %v1339_v52 = vpack.c.bf16 %v283_v50, %v281_v49  ;;  %v1341_v54 = vpack.c.bf16 %v282_v53, %v280_v51  ;;  %v285_v55 = vld [vmem:[#allocation2 + $0xa8] sm:$0xff]  ;;  %v287_v56 = vld [vmem:[#allocation2 + $0xb8] sm:$0xff]  ;;  %v284_v57 = vld [vmem:[#allocation2 + $0xa0] sm:$0xff] }
  0x45   :  { %97 = vperm.xlu0 %1941, %v74_v19   ;;  %100 = vperm.xlu1 %1942, %v75_v21   ;;  %v1343_v58 = vpack.c.bf16 %v287_v56, %v285_v55  ;;  %v286_v59 = vld [vmem:[#allocation2 + $0xb0] sm:$0xff]  ;;  %v289_v61 = vld [vmem:[#allocation2 + $0xc8] sm:$0xff]  ;;  %v291_v62 = vld [vmem:[#allocation2 + $0xd8] sm:$0xff] }
  0x46   :  { %1318 = vmatpush3.bf16.msra.mxu0 %v1315_v16  ;;  %v1345_v60 = vpack.c.bf16 %v286_v59, %v284_v57  ;;  %v288_v63 = vld [vmem:[#allocation2 + $0xc0] sm:$0xff]  ;;  %v1347_v0 = vpack.c.bf16 %v291_v62, %v289_v61  ;;  %v290_v1 = vld [vmem:[#allocation2 + $0xd0] sm:$0xff]  ;;  %v293_v3 = vld [vmem:[#allocation2 + $0xe8] sm:$0xff] }
  0x47   :  { %1320 = vmatprep.subr.bf16.mxu0 %v1319_v20  ;;  %1330 = vmatpush1.bf16.msra.mxu1 %v1329_v36  ;;  %v1349_v2 = vpack.c.bf16 %v290_v1, %v288_v63  ;;  %v295_v4 = vld [vmem:[#allocation2 + $0xf8] sm:$0xff]  ;;  %v292_v5 = vld [vmem:[#allocation2 + $0xe0] sm:$0xff]  ;;  %v294_v8 = vld [vmem:[#allocation2 + $0xf0] sm:$0xff] }
  0x48   :  { %1332 = vmatprep.subr.bf16.mxu1 %v1331_v40  ;;  %v1351_v6 = vpack.c.bf16 %v295_v4, %v293_v3  ;;  %v1353_v9 = vpack.c.bf16 %v294_v8, %v292_v5  ;;  %v421_v14 = vld [vmem:[#allocation5] sm:$0xff]  ;;  %v423_v15 = vld [vmem:[#allocation5 + $0x10] sm:$0xff]  ;;  %v426_v17 = vld [vmem:[#allocation5 + $0x28] sm:$0xff] }
  0x49   :  { %v428_v18 = vld [vmem:[#allocation5 + $0x38] sm:$0xff]  ;;  %v2222_v21 = vpack.c.bf16 %v423_v15, %v421_v14  ;;  %v425_v25 = vld [vmem:[#allocation5 + $0x20] sm:$0xff]  ;;  %v427_v26 = vld [vmem:[#allocation5 + $0x30] sm:$0xff] }
  0x4a   :  { %1322 = vmatpush3.bf16.msra.mxu0 %v1319_v20  ;;  %v2227_v23 = vpack.c.bf16 %v428_v18, %v426_v17  ;;  %v430_v28 = vld [vmem:[#allocation5 + $0x48] sm:$0xff]  ;;  %v432_v29 = vld [vmem:[#allocation5 + $0x58] sm:$0xff]  ;;  %v2234_v33 = vpack.c.bf16 %v427_v26, %v425_v25  ;;  %v429_v35 = vld [vmem:[#allocation5 + $0x40] sm:$0xff] }
  0x4b   :  { %1356 = vmatprep.subr.bf16.mxu0 %v2211_v24  ;;  %1334 = vmatpush1.bf16.msra.mxu1 %v1333_v42  ;;  %v2239_v34 = vpack.c.bf16 %v432_v29, %v430_v28  ;;  %v431_v36 = vld [vmem:[#allocation5 + $0x50] sm:$0xff]  ;;  %v434_v38 = vld [vmem:[#allocation5 + $0x68] sm:$0xff]  ;;  %v436_v39 = vld [vmem:[#allocation5 + $0x78] sm:$0xff] }
  0x4c   :  { %1336 = vmatprep.subr.bf16.mxu1 %v1335_v46  ;;  %v2246_v42 = vpack.c.bf16 %v431_v36, %v429_v35  ;;  %v2250_v43 = vpack.c.bf16 %v436_v39, %v434_v38  ;;  %v433_v44 = vld [vmem:[#allocation5 + $0x60] sm:$0xff]  ;;  %v435_v45 = vld [vmem:[#allocation5 + $0x70] sm:$0xff]  ;;  %v438_v47 = vld [vmem:[#allocation5 + $0x88] sm:$0xff] }
  0x4d   :  { %v2256_v49 = vpack.c.bf16 %v435_v45, %v433_v44  ;;  %v439_v53 = vld [vmem:[#allocation5 + $0x90] sm:$0xff]  ;;  %v444_v55 = vld [vmem:[#allocation5 + $0xb8] sm:$0xff]  ;;  %v441_v59 = vld [vmem:[#allocation5 + $0xa0] sm:$0xff] }
  0x4e   :  { %v446_v61 = vld [vmem:[#allocation5 + $0xc8] sm:$0xff]  ;;  %v448_v62 = vld [vmem:[#allocation5 + $0xd8] sm:$0xff]  ;;  %v445_v1 = vld [vmem:[#allocation5 + $0xc0] sm:$0xff] }
  0x4f   :  { %1338 = vmatpush1.bf16.msra.mxu1 %v1337_v48  ;;  %v440_v48 = vld [vmem:[#allocation5 + $0x98] sm:$0xff]  ;;  %v450_v3 = vld [vmem:[#allocation5 + $0xe8] sm:$0xff]  ;;  %v449_v8 = vld [vmem:[#allocation5 + $0xe0] sm:$0xff] }
  0x50   :  { %1340 = vmatprep.subr.bf16.mxu1 %v1339_v52  ;;  %v2259_v51 = vpack.c.bf16 %v440_v48, %v438_v47  ;;  %v437_v52 = vld [vmem:[#allocation5 + $0x80] sm:$0xff]  ;;  %v452_v4 = vld [vmem:[#allocation5 + $0xf8] sm:$0xff]  ;;  %v458_v17 = vld [vmem:[#allocation5 + $0x128] sm:$0xff] }
  0x51   :  { %v2265_v57 = vpack.c.bf16 %v439_v53, %v437_v52  ;;  %v453_v15 = vld [vmem:[#allocation5 + $0x100] sm:$0xff]  ;;  %v460_v18 = vld [vmem:[#allocation5 + $0x138] sm:$0xff]  ;;  %v459_v25 = vld [vmem:[#allocation5 + $0x130] sm:$0xff] }
  0x52   :  { %v462_v26 = vld [vmem:[#allocation5 + $0x148] sm:$0xff]  ;;  %v468_v35 = vld [vmem:[#allocation5 + $0x178] sm:$0xff]  ;;  %v465_v38 = vld [vmem:[#allocation5 + $0x160] sm:$0xff] }
  0x53   :  { %1342 = vmatpush1.bf16.msra.mxu1 %v1341_v54  ;;  %v442_v54 = vld [vmem:[#allocation5 + $0xa8] sm:$0xff]  ;;  %v467_v39 = vld [vmem:[#allocation5 + $0x170] sm:$0xff] }
  0x54   :  { %1344 = vmatprep.subr.bf16.mxu1 %v1343_v58  ;;  %v2269_v58 = vpack.c.bf16 %v444_v55, %v442_v54  ;;  %v2308_v44 = vpack.c.bf16 %v467_v39, %v465_v38  ;;  %v471_v47 = vld [vmem:[#allocation5 + $0x190] sm:$0xff]  ;;  %v474_v48 = vld [vmem:[#allocation5 + $0x1a8] sm:$0xff]  ;;  %v473_v54 = vld [vmem:[#allocation5 + $0x1a0] sm:$0xff] }
  0x55   :  { %v475_v55 = vld [vmem:[#allocation5 + $0x1b0] sm:$0xff] }
  0x57   :  { %1346 = vmatpush1.bf16.msra.mxu1 %v1345_v60  ;;  %v443_v60 = vld [vmem:[#allocation5 + $0xb0] sm:$0xff] }
  0x58   :  { %1348 = vmatprep.subr.bf16.mxu1 %v1347_v0  ;;  %v2272_v63 = vpack.c.bf16 %v443_v60, %v441_v59  ;;  %v2275_v0 = vpack.c.bf16 %v448_v62, %v446_v61  ;;  %v480_v59 = vld [vmem:[#allocation5 + $0x1d8] sm:$0xff]  ;;  %v2320_v60 = vpack.c.bf16 %v475_v55, %v473_v54  ;;  %v477_v62 = vld [vmem:[#allocation5 + $0x1c0] sm:$0xff] }
  0x5b   :  { %1350 = vmatpush1.bf16.msra.mxu1 %v1349_v2  ;;  %v447_v2 = vld [vmem:[#allocation5 + $0xd0] sm:$0xff] }
  0x5c   :  { %1352 = vmatprep.subr.bf16.mxu1 %v1351_v6  ;;  %v2278_v5 = vpack.c.bf16 %v447_v2, %v445_v1  ;;  %v2281_v6 = vpack.c.bf16 %v452_v4, %v450_v3  ;;  %v479_v1 = vld [vmem:[#allocation5 + $0x1d0] sm:$0xff]  ;;  %v482_v2 = vld [vmem:[#allocation5 + $0x1e8] sm:$0xff]  ;;  %v484_v3 = vld [vmem:[#allocation5 + $0x1f8] sm:$0xff] }
  0x5d   :  { %v2326_v4 = vpack.c.bf16 %v479_v1, %v477_v62 }
  0x5f   :  { %1354 = vmatpush1.bf16.msra.mxu1 %v1353_v9  ;;  %v451_v9 = vld [vmem:[#allocation5 + $0xf0] sm:$0xff] }
  0x60   :  { %1612 = vmatprep.subr.bf16.mxu1 %v2211_v24 }
  0xb8   :  { %v80_v12 = vpop.permute.xlu0 %79  ;;  %v86_v13 = vpop.permute.xlu1 %85 }
  0xb9   :  { %vm102_vm1 = vcmp.eq.s32.totalorder %v2216_v11, %v80_v12  ;;  %vm104_vm2 = vcmp.eq.s32.totalorder %v2216_v11, %v86_v13  ;;  %v456_v12 = vld [vmem:[#allocation5 + $0x118] sm:$0xff]  ;;  %v2284_v13 = vpack.c.bf16 %v451_v9, %v449_v8  ;;  %v2329_v8 = vpack.c.bf16 %v484_v3, %v482_v2  ;;  %v481_v9 = vld [vmem:[#allocation5 + $0x1e0] sm:$0xff] }
  0xba   :  { %v1211_v16 = vsel %vm102_vm1, 1.0, %v2077_v7  ;;  %v1213_v22 = vsel %vm104_vm2, 1.0, %v2077_v7 }
  0xbb   :  { %1295 = vmatprep.mubr.msk.f32.mxu0 %vm134_vm0, %v1211_v16  ;;  %v455_v16 = vld [vmem:[#allocation5 + $0x110] sm:$0xff] }
  0xbc   :  { %v83_v19 = vpop.permute.xlu0 %82  ;;  %v89_v20 = vpop.permute.xlu1 %88 }
  0xbd   :  { %vm103_vm3 = vcmp.eq.s32.totalorder %v2216_v11, %v83_v19  ;;  %vm105_vm4 = vcmp.eq.s32.totalorder %v2216_v11, %v89_v20  ;;  %v2290_v19 = vpack.c.bf16 %v455_v16, %v453_v15  ;;  %v2293_v20 = vpack.c.bf16 %v460_v18, %v458_v17 }
  0xbe   :  { %v1212_v27 = vsel %vm103_vm3, 1.0, %v2077_v7  ;;  %v1214_v30 = vsel %vm105_vm4, 1.0, %v2077_v7 }
  0xbf   :  { %1296 = vmatmul.mubr.msk.f32.vlgmr.msra.gmra.mrb[0].mxu0 %vm134_vm0, %v1212_v27  ;;  %v464_v27 = vld [vmem:[#allocation5 + $0x158] sm:$0xff] }
  0xc0   :  { %v92_v31 = vpop.permute.xlu0 %91  ;;  %1298 = vmatprep.mubr.msk.f32.mxu0 %vm134_vm0, %v1213_v22  ;;  %v95_v32 = vpop.permute.xlu1 %94  ;;  %1358 = vmatpush1.bf16.msra.mxu0 %v2222_v21  ;;  %v457_v22 = vld [vmem:[#allocation5 + $0x120] sm:$0xff]  ;;  %v2299_v29 = vpack.c.bf16 %v464_v27, %v462_v26 }
  0xc1   :  { %vm106_vm5 = vcmp.eq.s32.totalorder %v2216_v11, %v92_v31  ;;  %vm107_vm6 = vcmp.eq.s32.totalorder %v2216_v11, %v95_v32  ;;  %1360 = vmatprep.subr.bf16.mxu0 %v2227_v23  ;;  %v2296_v28 = vpack.c.bf16 %v459_v25, %v457_v22  ;;  %v463_v31 = vld [vmem:[#allocation5 + $0x150] sm:$0xff]  ;;  %v466_v32 = vld [vmem:[#allocation5 + $0x168] sm:$0xff] }
  0xc2   :  { %v1215_v37 = vsel %vm106_vm5, 1.0, %v2077_v7  ;;  %v1216_v40 = vsel %vm107_vm6, 1.0, %v2077_v7 }
  0xc3   :  { %1299 = vmatmul.mubr.msk.f32.gmra.mrb[2].mxu0 %vm134_vm0, %v1214_v30  ;;  %v461_v30 = vld [vmem:[#allocation5 + $0x140] sm:$0xff] }
  0xc4   :  { %1301 = vmatprep.mubr.msk.f32.mxu0 %vm134_vm0, %v1215_v37  ;;  %v98_v41 = vpop.permute.xlu0 %97  ;;  %1362 = vmatpush1.bf16.msra.mxu0 %v2234_v33  ;;  %v101_v50 = vpop.permute.xlu1 %100  ;;  %v2302_v36 = vpack.c.bf16 %v463_v31, %v461_v30  ;;  %v2305_v37 = vpack.c.bf16 %v468_v35, %v466_v32  ;;  %v299_v31 = vshrl.u32 %v76_v10, 7  ;;  %v296_v35 = vld [vmem:[%s2622_s4] sm:$0x3] }
  0xc5   :  { %vm108_vm7 = vcmp.eq.s32.totalorder %v2216_v11, %v98_v41  ;;  %1364 = vmatprep.subr.bf16.mxu0 %v2239_v34  ;;  %vm109_vm8 = vcmp.eq.s32.totalorder %v2216_v11, %v101_v50  ;;  %v454_v11 = vld [vmem:[#allocation5 + $0x108] sm:$0xff]  ;;  %v472_v41 = vld [vmem:[#allocation5 + $0x198] sm:$0xff] }
  0xc6   :  { %v1217_v46 = vsel %vm108_vm7, 1.0, %v2077_v7  ;;  %v1218_v56 = vsel %vm109_vm8, 1.0, %v2077_v7  ;;  %v2287_v14 = vpack.c.bf16 %v456_v12, %v454_v11  ;;  %v476_v50 = vld [vmem:[#allocation5 + $0x1b8] sm:$0xff]  ;;  %v483_v11 = vld [vmem:[#allocation5 + $0x1f0] sm:$0xff]  ;;  %v300_v32 = vsub.s32 0, %v299_v31 }
  0xc7   :  { %1302 = vmatmul.mubr.msk.f32.gmra.mrb[4].mxu0 %vm134_vm0, %v1216_v40  ;;  %v470_v40 = vld [vmem:[#allocation5 + $0x188] sm:$0xff]  ;;  %v2317_v53 = vpack.c.bf16 %v476_v50, %v474_v48  ;;  %v2333_v12 = vpack.c.bf16 %v483_v11, %v481_v9  ;;  %v304_v38 = vsub.s32 1, %v299_v31 }
  0xc8   :  { %1304 = vmatprep.mubr.msk.f32.mxu0 %vm134_vm0, %v1217_v46  ;;  %1366 = vmatpush1.bf16.msra.mxu0 %v2246_v42  ;;  %v2311_v45 = vpack.c.bf16 %v472_v41, %v470_v40  ;;  %v469_v46 = vld [vmem:[#allocation5 + $0x180] sm:$0xff]  ;;  %v2413_v39 = vrot.slane %v296_v35, %v300_v32 }
  0xc9   :  { %1368 = vmatprep.subr.bf16.mxu0 %v2250_v43  ;;  %v2314_v52 = vpack.c.bf16 %v471_v47, %v469_v46  ;;  %v2415_v40 = vrot.slane %v296_v35, %v304_v38 }
  0xcb   :  { %1305 = vmatmul.mubr.msk.f32.gmra.mrb[6].mxu0 %vm134_vm0, %v1218_v56  ;;  %v478_v56 = vld [vmem:[#allocation5 + $0x1c8] sm:$0xff] }
  0xcc   :  { %1370 = vmatpush1.bf16.msra.mxu0 %v2256_v49  ;;  %549 = vmatprep.mubr.f32.mxu0 %v2077_v7  ;;  %v2323_v61 = vpack.c.bf16 %v480_v59, %v478_v56 }
  0xcd   :  { %1372 = vmatprep.subr.bf16.mxu0 %v2259_v51 }
  0xd0   :  { %1374 = vmatpush1.bf16.msra.mxu0 %v2265_v57 }
  0xd1   :  { %1376 = vmatprep.subr.bf16.mxu0 %v2269_v58 }
  0xd4   :  { %1378 = vmatpush1.bf16.msra.mxu0 %v2272_v63 }
  0xd5   :  { %1380 = vmatprep.subr.bf16.mxu0 %v2275_v0 }
  0xd8   :  { %1382 = vmatpush1.bf16.msra.mxu0 %v2278_v5 }
  0xd9   :  { %1384 = vmatprep.subr.bf16.mxu0 %v2281_v6 }
  0xdc   :  { %1386 = vmatpush1.bf16.msra.mxu0 %v2284_v13 }
  0xdd   :  { %1388 = vmatprep.subr.bf16.mxu0 %v2287_v14 }
  0xe0   :  { %1390 = vmatpush1.bf16.msra.mxu0 %v2290_v19 }
  0xe1   :  { %1392 = vmatprep.subr.bf16.mxu0 %v2293_v20 }
  0xe4   :  { %1394 = vmatpush1.bf16.msra.mxu0 %v2296_v28 }
  0xe5   :  { %1396 = vmatprep.subr.bf16.mxu0 %v2299_v29 }
  0xe8   :  { %1398 = vmatpush1.bf16.msra.mxu0 %v2302_v36 }
  0xe9   :  { %1400 = vmatprep.subr.bf16.mxu0 %v2305_v37 }
  0xec   :  { %1402 = vmatpush1.bf16.msra.mxu0 %v2308_v44 }
  0xed   :  { %1404 = vmatprep.subr.bf16.mxu0 %v2311_v45 }
  0xf0   :  { %1406 = vmatpush1.bf16.msra.mxu0 %v2314_v52 }
  0xf1   :  { %1408 = vmatprep.subr.bf16.mxu0 %v2317_v53 }
  0xf4   :  { %1410 = vmatpush1.bf16.msra.mxu0 %v2320_v60 }
  0xf5   :  { %1412 = vmatprep.subr.bf16.mxu0 %v2323_v61 }
  0xf8   :  { %1414 = vmatpush1.bf16.msra.mxu0 %v2326_v4 }
  0xf9   :  { %1416 = vmatprep.subr.bf16.mxu0 %v2329_v8 }
  0xfc   :  { %1418 = vmatpush1.bf16.msra.mxu0 %v2333_v12 }
  0xfd   :  { %1420 = vmatprep.subr.bf16.mxu0 %v2211_v24 }
  0xff   :  { %550 = vmatmul.mubr.f32.vlgmr.msra.gmra.mrb[8].mxu0 %v2077_v7 }
 0x100   :  { %1422 = vmatpush1.bf16.msra.mxu0 %v2222_v21 }
 0x101   :  { %1424 = vmatprep.subr.bf16.mxu0 %v2227_v23 }
 0x104   :  { %1426 = vmatpush1.bf16.msra.mxu0 %v2234_v33 }
 0x105   :  { %1428 = vmatprep.subr.bf16.mxu0 %v2239_v34 }
 0x108   :  { %1430 = vmatpush1.bf16.msra.mxu0 %v2246_v42 }
 0x109   :  { %1432 = vmatprep.subr.bf16.mxu0 %v2250_v43 }
 0x10c   :  { %1434 = vmatpush1.bf16.msra.mxu0 %v2256_v49 }
 0x10d   :  { %1436 = vmatprep.subr.bf16.mxu0 %v2259_v51 }
 0x110   :  { %1438 = vmatpush1.bf16.msra.mxu0 %v2265_v57 }
 0x111   :  { %1440 = vmatprep.subr.bf16.mxu0 %v2269_v58 }
 0x114   :  { %1442 = vmatpush1.bf16.msra.mxu0 %v2272_v63 }
 0x115   :  { %1444 = vmatprep.subr.bf16.mxu0 %v2275_v0 }
 0x118   :  { %1446 = vmatpush1.bf16.msra.mxu0 %v2278_v5 }
 0x119   :  { %1448 = vmatprep.subr.bf16.mxu0 %v2281_v6 }
 0x11c   :  { %1450 = vmatpush1.bf16.msra.mxu0 %v2284_v13 }
 0x11d   :  { %1452 = vmatprep.subr.bf16.mxu0 %v2287_v14 }
 0x120   :  { %1454 = vmatpush1.bf16.msra.mxu0 %v2290_v19 }
 0x121   :  { %1456 = vmatprep.subr.bf16.mxu0 %v2293_v20 }
 0x124   :  { %1458 = vmatpush1.bf16.msra.mxu0 %v2296_v28 }
 0x125   :  { %1460 = vmatprep.subr.bf16.mxu0 %v2299_v29 }
 0x128   :  { %1462 = vmatpush1.bf16.msra.mxu0 %v2302_v36 }
 0x129   :  { %1464 = vmatprep.subr.bf16.mxu0 %v2305_v37 }
 0x12c   :  { %1466 = vmatpush1.bf16.msra.mxu0 %v2308_v44 }
 0x12d   :  { %1468 = vmatprep.subr.bf16.mxu0 %v2311_v45 }
 0x130   :  { %1470 = vmatpush1.bf16.msra.mxu0 %v2314_v52 }
 0x131   :  { %1472 = vmatprep.subr.bf16.mxu0 %v2317_v53 }
 0x134   :  { %1474 = vmatpush1.bf16.msra.mxu0 %v2320_v60 }
 0x135   :  { %1476 = vmatprep.subr.bf16.mxu0 %v2323_v61 }
 0x138   :  { %1478 = vmatpush1.bf16.msra.mxu0 %v2326_v4 }
 0x139   :  { %1480 = vmatprep.subr.bf16.mxu0 %v2329_v8 }
 0x13c   :  { %1482 = vmatpush1.bf16.msra.mxu0 %v2333_v12 }
 0x13d   :  { %1484 = vmatprep.subr.bf16.mxu0 %v2211_v24 }
 0x192   :  { %v1297_v15 = vpop.f32.mrb[0].mxu0 }
 0x193   :  { %v225_v16 = vpop.f32.mrb[1].mxu0 }
 0x194   :  { %373 = vmatmul.mubr.f32.vlgmr.msra.gmra.mrb[0].mxu1 %v225_v16 }
 0x195   :  { %378 = vmatprep.mubr.f32.mxu1 %v2077_v7  ;;  %1614 = vmatpush1.bf16.msra.mxu1 %v2222_v21 }
 0x196   :  { %v1300_v17 = vpop.f32.mrb[2].mxu0  ;;  %1616 = vmatprep.subr.bf16.mxu1 %v2227_v23 }
 0x197   :  { %v235_v18 = vpop.f32.mrb[3].mxu0 }
 0x198   :  { %379 = vmatmul.mubr.f32.gmra.mrb[2].mxu1 %v1297_v15 }
 0x199   :  { %384 = vmatprep.mubr.f32.mxu1 %v2077_v7  ;;  %1618 = vmatpush1.bf16.msra.mxu1 %v2234_v33 }
 0x19a   :  { %v1303_v22 = vpop.f32.mrb[4].mxu0  ;;  %1620 = vmatprep.subr.bf16.mxu1 %v2239_v34 }
 0x19b   :  { %v245_v25 = vpop.f32.mrb[5].mxu0 }
 0x19c   :  { %385 = vmatmul.mubr.f32.gmra.mrb[4].mxu1 %v235_v18 }
 0x19d   :  { %390 = vmatprep.mubr.f32.mxu1 %v2077_v7  ;;  %1622 = vmatpush1.bf16.msra.mxu1 %v2246_v42 }
 0x19e   :  { %v1306_v26 = vpop.f32.mrb[6].mxu0  ;;  %1624 = vmatprep.subr.bf16.mxu1 %v2250_v43 }
 0x19f   :  { %v255_v27 = vpop.f32.mrb[7].mxu0 }
 0x1a0   :  { %391 = vmatmul.mubr.f32.gmra.mrb[6].mxu1 %v1300_v17 }
 0x1a1   :  { %396 = vmatprep.mubr.f32.mxu1 %v2077_v7  ;;  %1626 = vmatpush1.bf16.msra.mxu1 %v2256_v49 }
 0x1a2   :  { %1628 = vmatprep.subr.bf16.mxu1 %v2259_v51 }
 0x1a4   :  { %397 = vmatmul.mubr.f32.gmra.mrb[8].mxu1 %v245_v25 }
 0x1a5   :  { %402 = vmatprep.mubr.f32.mxu1 %v2077_v7  ;;  %1630 = vmatpush1.bf16.msra.mxu1 %v2265_v57 }
 0x1a6   :  { %1632 = vmatprep.subr.bf16.mxu1 %v2269_v58 }
 0x1a8   :  { %403 = vmatmul.mubr.f32.gmra.mrb[10].mxu1 %v1303_v22 }
 0x1a9   :  { %408 = vmatprep.mubr.f32.mxu1 %v2077_v7  ;;  %1634 = vmatpush1.bf16.msra.mxu1 %v2272_v63 }
 0x1aa   :  { %1636 = vmatprep.subr.bf16.mxu1 %v2275_v0 }
 0x1ac   :  { %409 = vmatmul.mubr.f32.gmra.mrb[12].mxu1 %v255_v27 }
 0x1ad   :  { %414 = vmatprep.mubr.f32.mxu1 %v2077_v7  ;;  %1638 = vmatpush1.bf16.msra.mxu1 %v2278_v5 }
 0x1ae   :  { %1640 = vmatprep.subr.bf16.mxu1 %v2281_v6 }
 0x1b0   :  { %415 = vmatmul.mubr.f32.gmra.mrb[14].mxu1 %v1306_v26 }
 0x1b1   :  { %1642 = vmatpush1.bf16.msra.mxu1 %v2284_v13 }
 0x1b2   :  { %1644 = vmatprep.subr.bf16.mxu1 %v2287_v14 }
 0x1b5   :  { %1646 = vmatpush1.bf16.msra.mxu1 %v2290_v19 }
 0x1b6   :  { %1648 = vmatprep.subr.bf16.mxu1 %v2293_v20 }
 0x1b9   :  { %1650 = vmatpush1.bf16.msra.mxu1 %v2296_v28 }
 0x1ba   :  { %1652 = vmatprep.subr.bf16.mxu1 %v2299_v29 }
 0x1bd   :  { %1654 = vmatpush1.bf16.msra.mxu1 %v2302_v36 }
 0x1be   :  { %1656 = vmatprep.subr.bf16.mxu1 %v2305_v37 }
 0x1c1   :  { %1658 = vmatpush1.bf16.msra.mxu1 %v2308_v44 }
 0x1c2   :  { %1660 = vmatprep.subr.bf16.mxu1 %v2311_v45 }
 0x1c5   :  { %1662 = vmatpush1.bf16.msra.mxu1 %v2314_v52 }
 0x1c6   :  { %1664 = vmatprep.subr.bf16.mxu1 %v2317_v53 }
 0x1c9   :  { %1666 = vmatpush1.bf16.msra.mxu1 %v2320_v60 }
 0x1ca   :  { %1668 = vmatprep.subr.bf16.mxu1 %v2323_v61 }
 0x1cd   :  { %1670 = vmatpush1.bf16.msra.mxu1 %v2326_v4 }
 0x1ce   :  { %1672 = vmatprep.subr.bf16.mxu1 %v2329_v8 }
 0x1d1   :  { %1674 = vmatpush1.bf16.msra.mxu1 %v2333_v12 }
 0x1d2   :  { %1676 = vmatprep.subr.bf16.mxu1 %v2211_v24  ;;  %v551_v7 = vpop.f32.mrb[8].mxu0 }
 0x1d3   :  { %v553_v30 = vpop.f32.mrb[9].mxu0 }
 0x267   :  { %v374_v41 = vpop.f32.mrb[0].mxu1 }
 0x268   :  { %v375_v46 = vadd.f32 %v374_v41, %v2413_v39  ;;  %v376_v47 = vpop.f32.mrb[1].mxu1 }
 0x269   :  { %v377_v48 = vadd.f32 %v376_v47, %v2415_v40 }
 0x26a   :  { %v556_v50 = vadd.f32 %v551_v7, %v375_v46 }
 0x26b   :  { %v557_v54 = vadd.f32 %v553_v30, %v377_v48  ;;  %v380_v55 = vpop.f32.mrb[2].mxu1 }
 0x26c   :  { %v382_v10 = vpop.f32.mrb[3].mxu1  ;;  %v381_v9 = vadd.f32 %v380_v55, %v2413_v39 }
 0x26d   :  { %1943 = vtanh.f32 %v557_v54  ;;  %v383_v11 = vadd.f32 %v382_v10, %v2415_v40 }
 0x26e   :  { %1945 = vtanh.f32 %v556_v50 }
 0x26f   :  { %v2419_v56 = vpop.f32.mrb[4].mxu1 }
 0x270   :  { %v2421_v59 = vpop.f32.mrb[5].mxu1  ;;  %v387_v26 = vadd.f32 %v2419_v56, %v2413_v39 }
 0x271   :  { %v389_v27 = vadd.f32 %v2421_v59, %v2415_v40 }
 0x273   :  { %v2423_v62 = vpop.f32.mrb[6].mxu1 }
 0x274   :  { %v2425_v1 = vpop.f32.mrb[7].mxu1  ;;  %v393_v41 = vadd.f32 %v2423_v62, %v2413_v39 }
 0x275   :  { %v395_v46 = vadd.f32 %v2425_v1, %v2415_v40 }
 0x277   :  { %v1944_v2 = vpop.eup %1943 }
 0x278   :  { %v1946_v3 = vpop.eup %1945  ;;  %624 = vmatprep.mubr.f32.mxu0 %v1944_v2 }
 0x279   :  { %625 = vmatmul.mubr.f32.vlgmr.msra.gmra.mrb[10].mxu0 %v1946_v3 }
 0x27a   :  { %1486 = vmatpush1.bf16.msra.mxu0 %v2222_v21 }
 0x27b   :  { %1488 = vmatprep.subr.bf16.mxu0 %v2227_v23 }
 0x27e   :  { %1490 = vmatpush1.bf16.msra.mxu0 %v2234_v33 }
 0x27f   :  { %1492 = vmatprep.subr.bf16.mxu0 %v2239_v34 }
 0x282   :  { %1494 = vmatpush1.bf16.msra.mxu0 %v2246_v42 }
 0x283   :  { %1496 = vmatprep.subr.bf16.mxu0 %v2250_v43 }
 0x286   :  { %1498 = vmatpush1.bf16.msra.mxu0 %v2256_v49 }
 0x287   :  { %1500 = vmatprep.subr.bf16.mxu0 %v2259_v51 }
 0x28a   :  { %1502 = vmatpush1.bf16.msra.mxu0 %v2265_v57 }
 0x28b   :  { %1504 = vmatprep.subr.bf16.mxu0 %v2269_v58 }
 0x28e   :  { %1506 = vmatpush1.bf16.msra.mxu0 %v2272_v63 }
 0x28f   :  { %1508 = vmatprep.subr.bf16.mxu0 %v2275_v0 }
 0x292   :  { %1510 = vmatpush1.bf16.msra.mxu0 %v2278_v5 }
 0x293   :  { %1512 = vmatprep.subr.bf16.mxu0 %v2281_v6 }
 0x296   :  { %1514 = vmatpush1.bf16.msra.mxu0 %v2284_v13 }
 0x297   :  { %1516 = vmatprep.subr.bf16.mxu0 %v2287_v14 }
 0x29a   :  { %1518 = vmatpush1.bf16.msra.mxu0 %v2290_v19 }
 0x29b   :  { %1520 = vmatprep.subr.bf16.mxu0 %v2293_v20 }
 0x29e   :  { %1522 = vmatpush1.bf16.msra.mxu0 %v2296_v28 }
 0x29f   :  { %1524 = vmatprep.subr.bf16.mxu0 %v2299_v29 }
 0x2a2   :  { %1526 = vmatpush1.bf16.msra.mxu0 %v2302_v36 }
 0x2a3   :  { %1528 = vmatprep.subr.bf16.mxu0 %v2305_v37 }
 0x2a6   :  { %1530 = vmatpush1.bf16.msra.mxu0 %v2308_v44 }
 0x2a7   :  { %1532 = vmatprep.subr.bf16.mxu0 %v2311_v45 }
 0x2aa   :  { %1534 = vmatpush1.bf16.msra.mxu0 %v2314_v52 }
 0x2ab   :  { %1536 = vmatprep.subr.bf16.mxu0 %v2317_v53 }
 0x2ae   :  { %1538 = vmatpush1.bf16.msra.mxu0 %v2320_v60 }
 0x2af   :  { %1540 = vmatprep.subr.bf16.mxu0 %v2323_v61 }
 0x2b2   :  { %1542 = vmatpush1.bf16.msra.mxu0 %v2326_v4 }
 0x2b3   :  { %1544 = vmatprep.subr.bf16.mxu0 %v2329_v8 }
 0x2b6   :  { %1546 = vmatpush1.bf16.msra.mxu0 %v2333_v12 }
 0x2b7   :  { %1548 = vmatprep.subr.bf16.mxu0 %v2211_v24 }
 0x34c   :  { %v626_v15 = vpop.f32.mrb[10].mxu0 }
 0x34d   :  { %v631_v16 = vadd.f32 %v626_v15, %v381_v9  ;;  %v628_v17 = vpop.f32.mrb[11].mxu0 }
 0x34e   :  { %v632_v18 = vadd.f32 %v628_v17, %v383_v11 }
 0x350   :  { %1947 = vtanh.f32 %v632_v18 }
 0x351   :  { %1949 = vtanh.f32 %v631_v16 }
 0x35a   :  { %v1948_v22 = vpop.eup %1947 }
 0x35b   :  { %v1950_v25 = vpop.eup %1949  ;;  %699 = vmatprep.mubr.f32.mxu0 %v1948_v22 }
 0x35c   :  { %700 = vmatmul.mubr.f32.vlgmr.msra.gmra.mrb[12].mxu0 %v1950_v25  ;;  %v1093_v25 = vld [vmem:[#allocation7 + $0x40] sm:$0xff] }
 0x35d   :  { %1550 = vmatpush1.bf16.msra.mxu0 %v2222_v21 }
 0x35e   :  { %1552 = vmatprep.subr.bf16.mxu0 %v2227_v23 }
 0x361   :  { %1554 = vmatpush1.bf16.msra.mxu0 %v2234_v33 }
 0x362   :  { %1556 = vmatprep.subr.bf16.mxu0 %v2239_v34 }
 0x365   :  { %1558 = vmatpush1.bf16.msra.mxu0 %v2246_v42 }
 0x366   :  { %1560 = vmatprep.subr.bf16.mxu0 %v2250_v43 }
 0x369   :  { %1562 = vmatpush1.bf16.msra.mxu0 %v2256_v49 }
 0x36a   :  { %1564 = vmatprep.subr.bf16.mxu0 %v2259_v51 }
 0x36d   :  { %1566 = vmatpush1.bf16.msra.mxu0 %v2265_v57 }
 0x36e   :  { %1568 = vmatprep.subr.bf16.mxu0 %v2269_v58 }
 0x371   :  { %1570 = vmatpush1.bf16.msra.mxu0 %v2272_v63 }
 0x372   :  { %1572 = vmatprep.subr.bf16.mxu0 %v2275_v0 }
 0x375   :  { %1574 = vmatpush1.bf16.msra.mxu0 %v2278_v5 }
 0x376   :  { %1576 = vmatprep.subr.bf16.mxu0 %v2281_v6 }
 0x379   :  { %1578 = vmatpush1.bf16.msra.mxu0 %v2284_v13 }
 0x37a   :  { %1580 = vmatprep.subr.bf16.mxu0 %v2287_v14 }
 0x37d   :  { %1582 = vmatpush1.bf16.msra.mxu0 %v2290_v19 }
 0x37e   :  { %1584 = vmatprep.subr.bf16.mxu0 %v2293_v20 }
 0x381   :  { %1586 = vmatpush1.bf16.msra.mxu0 %v2296_v28 }
 0x382   :  { %1588 = vmatprep.subr.bf16.mxu0 %v2299_v29 }
 0x385   :  { %1590 = vmatpush1.bf16.msra.mxu0 %v2302_v36 }
 0x386   :  { %1592 = vmatprep.subr.bf16.mxu0 %v2305_v37 }
 0x389   :  { %1594 = vmatpush1.bf16.msra.mxu0 %v2308_v44 }
 0x38a   :  { %1596 = vmatprep.subr.bf16.mxu0 %v2311_v45 }
 0x38d   :  { %1598 = vmatpush1.bf16.msra.mxu0 %v2314_v52 }
 0x38e   :  { %1600 = vmatprep.subr.bf16.mxu0 %v2317_v53 }
 0x391   :  { %1602 = vmatpush1.bf16.msra.mxu0 %v2320_v60 }
 0x392   :  { %1604 = vmatprep.subr.bf16.mxu0 %v2323_v61 }
 0x395   :  { %1606 = vmatpush1.bf16.msra.mxu0 %v2326_v4 }
 0x396   :  { %1608 = vmatprep.subr.bf16.mxu0 %v2329_v8 }
 0x399   :  { %1610 = vmatpush1.bf16.msra.mxu0 %v2333_v12 }
 0x42f   :  { %v701_v7 = vpop.f32.mrb[12].mxu0 }
 0x430   :  { %v706_v30 = vadd.f32 %v701_v7, %v387_v26  ;;  %v703_v31 = vpop.f32.mrb[13].mxu0  ;;  %v1094_v26 = vld [vmem:[#allocation7 + $0x48] sm:$0xff]  ;;  %v1111_v7 = vld [vmem:[#allocation7 + $0xd0] sm:$0xff] }
 0x431   :  { %v707_v32 = vadd.f32 %v703_v31, %v389_v27  ;;  %v1885_v27 = vpack.c.bf16 %v1094_v26, %v1093_v25 }
 0x433   :  { %1951 = vtanh.f32 %v707_v32  ;;  %v1095_v32 = vld [vmem:[#allocation7 + $0x50] sm:$0xff] }
 0x434   :  { %1953 = vtanh.f32 %v706_v30  ;;  %v1112_v30 = vld [vmem:[#allocation7 + $0xd8] sm:$0xff] }
 0x435   :  { %v1887_v31 = vpack.c.bf16 %v1112_v30, %v1111_v7 }
 0x43d   :  { %v1952_v35 = vpop.eup %1951 }
 0x43e   :  { %v1954_v38 = vpop.eup %1953  ;;  %774 = vmatprep.mubr.f32.mxu0 %v1952_v35  ;;  %v1096_v35 = vld [vmem:[#allocation7 + $0x58] sm:$0xff] }
 0x43f   :  { %775 = vmatmul.mubr.f32.vlgmr.msra.gmra.mrb[14].mxu0 %v1954_v38  ;;  %v1889_v38 = vpack.c.bf16 %v1096_v35, %v1095_v32 }
 0x512   :  { %v776_v47 = vpop.f32.mrb[14].mxu0 }
 0x513   :  { %v781_v48 = vadd.f32 %v776_v47, %v393_v41  ;;  %v778_v50 = vpop.f32.mrb[15].mxu0  ;;  %v1113_v41 = vld [vmem:[#allocation7 + $0xe0] sm:$0xff] }
 0x514   :  { %v782_v54 = vadd.f32 %v778_v50, %v395_v46  ;;  %v1114_v46 = vld [vmem:[#allocation7 + $0xe8] sm:$0xff]  ;;  %v1097_v47 = vld [vmem:[#allocation7 + $0x60] sm:$0xff] }
 0x515   :  { %v1098_v50 = vld [vmem:[#allocation7 + $0x68] sm:$0xff] }
 0x516   :  { %1955 = vtanh.f32 %v782_v54  ;;  %v1115_v54 = vld [vmem:[#allocation7 + $0xf0] sm:$0xff] }
 0x517   :  { %1957 = vtanh.f32 %v781_v48  ;;  %v1891_v48 = vpack.c.bf16 %v1114_v46, %v1113_v41 }
 0x520   :  { %v1956_v55 = vpop.eup %1955 }
 0x521   :  { %v1958_v10 = vpop.eup %1957  ;;  %849 = vmatprep.mubr.f32.mxu1 %v1956_v55  ;;  %v1116_v55 = vld [vmem:[#allocation7 + $0xf8] sm:$0xff] }
 0x522   :  { %850 = vmatmul.mubr.f32.vlgmr.msra.gmra.mrb[8].mxu1 %v1958_v10  ;;  %v1893_v10 = vpack.c.bf16 %v1098_v50, %v1097_v47 }
 0x523   :  { %1678 = vmatpush1.bf16.msra.mxu1 %v2222_v21 }
 0x524   :  { %1680 = vmatprep.subr.bf16.mxu1 %v2227_v23 }
 0x527   :  { %1682 = vmatpush1.bf16.msra.mxu1 %v2234_v33 }
 0x528   :  { %1684 = vmatprep.subr.bf16.mxu1 %v2239_v34 }
 0x52b   :  { %1686 = vmatpush1.bf16.msra.mxu1 %v2246_v42 }
 0x52c   :  { %1688 = vmatprep.subr.bf16.mxu1 %v2250_v43 }
 0x52f   :  { %1690 = vmatpush1.bf16.msra.mxu1 %v2256_v49 }
 0x530   :  { %1692 = vmatprep.subr.bf16.mxu1 %v2259_v51 }
 0x533   :  { %1694 = vmatpush1.bf16.msra.mxu1 %v2265_v57 }
 0x534   :  { %1696 = vmatprep.subr.bf16.mxu1 %v2269_v58 }
 0x537   :  { %1698 = vmatpush1.bf16.msra.mxu1 %v2272_v63 }
 0x538   :  { %1700 = vmatprep.subr.bf16.mxu1 %v2275_v0 }
 0x53b   :  { %1702 = vmatpush1.bf16.msra.mxu1 %v2278_v5 }
 0x53c   :  { %1704 = vmatprep.subr.bf16.mxu1 %v2281_v6 }
 0x53f   :  { %1706 = vmatpush1.bf16.msra.mxu1 %v2284_v13 }
 0x540   :  { %1708 = vmatprep.subr.bf16.mxu1 %v2287_v14 }
 0x543   :  { %1710 = vmatpush1.bf16.msra.mxu1 %v2290_v19 }
 0x544   :  { %1712 = vmatprep.subr.bf16.mxu1 %v2293_v20 }
 0x547   :  { %1714 = vmatpush1.bf16.msra.mxu1 %v2296_v28 }
 0x548   :  { %1716 = vmatprep.subr.bf16.mxu1 %v2299_v29 }
 0x54b   :  { %1718 = vmatpush1.bf16.msra.mxu1 %v2302_v36 }
 0x54c   :  { %1720 = vmatprep.subr.bf16.mxu1 %v2305_v37 }
 0x54f   :  { %1722 = vmatpush1.bf16.msra.mxu1 %v2308_v44 }
 0x550   :  { %1724 = vmatprep.subr.bf16.mxu1 %v2311_v45 }
 0x553   :  { %1726 = vmatpush1.bf16.msra.mxu1 %v2314_v52 }
 0x554   :  { %1728 = vmatprep.subr.bf16.mxu1 %v2317_v53 }
 0x557   :  { %1730 = vmatpush1.bf16.msra.mxu1 %v2320_v60 }
 0x558   :  { %1732 = vmatprep.subr.bf16.mxu1 %v2323_v61 }
 0x55b   :  { %1734 = vmatpush1.bf16.msra.mxu1 %v2326_v4 }
 0x55c   :  { %1736 = vmatprep.subr.bf16.mxu1 %v2329_v8 }
 0x55f   :  { %1738 = vmatpush1.bf16.msra.mxu1 %v2333_v12 }
 0x560   :  { %1740 = vmatprep.subr.bf16.mxu1 %v2211_v24 }
 0x5f5   :  { %v851_v56 = vpop.f32.mrb[8].mxu1 }
 0x5f6   :  { %v1915_v59 = vadd.f32 %v851_v56, %v2413_v39  ;;  %v853_v62 = vpop.f32.mrb[9].mxu1  ;;  %v1895_v56 = vpack.c.bf16 %v1116_v55, %v1115_v54 }
 0x5f7   :  { %v1916_v1 = vadd.f32 %v853_v62, %v2415_v40  ;;  %v1100_v62 = vld [vmem:[#allocation7 + $0x78] sm:$0xff] }
 0x5f9   :  { %1959 = vtanh.f32 %v1916_v1 }
 0x5fa   :  { %1961 = vtanh.f32 %v1915_v59  ;;  %v1099_v59 = vld [vmem:[#allocation7 + $0x70] sm:$0xff] }
 0x5fb   :  { %v1897_v1 = vpack.c.bf16 %v1100_v62, %v1099_v59 }
 0x603   :  { %v1960_v2 = vpop.eup %1959 }
 0x604   :  { %v1962_v3 = vpop.eup %1961  ;;  %924 = vmatprep.mubr.f32.mxu1 %v1960_v2 }
 0x605   :  { %925 = vmatmul.mubr.f32.vlgmr.msra.gmra.mrb[10].mxu1 %v1962_v3 }
 0x606   :  { %1742 = vmatpush1.bf16.msra.mxu1 %v2222_v21 }
 0x607   :  { %1744 = vmatprep.subr.bf16.mxu1 %v2227_v23 }
 0x60a   :  { %1746 = vmatpush1.bf16.msra.mxu1 %v2234_v33 }
 0x60b   :  { %1748 = vmatprep.subr.bf16.mxu1 %v2239_v34 }
 0x60e   :  { %1750 = vmatpush1.bf16.msra.mxu1 %v2246_v42 }
 0x60f   :  { %1752 = vmatprep.subr.bf16.mxu1 %v2250_v43 }
 0x612   :  { %1754 = vmatpush1.bf16.msra.mxu1 %v2256_v49 }
 0x613   :  { %1756 = vmatprep.subr.bf16.mxu1 %v2259_v51 }
 0x616   :  { %1758 = vmatpush1.bf16.msra.mxu1 %v2265_v57 }
 0x617   :  { %1760 = vmatprep.subr.bf16.mxu1 %v2269_v58 }
 0x61a   :  { %1762 = vmatpush1.bf16.msra.mxu1 %v2272_v63 }
 0x61b   :  { %1764 = vmatprep.subr.bf16.mxu1 %v2275_v0 }
 0x61e   :  { %1766 = vmatpush1.bf16.msra.mxu1 %v2278_v5 }
 0x61f   :  { %1768 = vmatprep.subr.bf16.mxu1 %v2281_v6 }
 0x622   :  { %1770 = vmatpush1.bf16.msra.mxu1 %v2284_v13 }
 0x623   :  { %1772 = vmatprep.subr.bf16.mxu1 %v2287_v14 }
 0x626   :  { %1774 = vmatpush1.bf16.msra.mxu1 %v2290_v19 }
 0x627   :  { %1776 = vmatprep.subr.bf16.mxu1 %v2293_v20 }
 0x62a   :  { %1778 = vmatpush1.bf16.msra.mxu1 %v2296_v28 }
 0x62b   :  { %1780 = vmatprep.subr.bf16.mxu1 %v2299_v29 }
 0x62e   :  { %1782 = vmatpush1.bf16.msra.mxu1 %v2302_v36 }
 0x62f   :  { %1784 = vmatprep.subr.bf16.mxu1 %v2305_v37 }
 0x632   :  { %1786 = vmatpush1.bf16.msra.mxu1 %v2308_v44 }
 0x633   :  { %1788 = vmatprep.subr.bf16.mxu1 %v2311_v45 }
 0x636   :  { %1790 = vmatpush1.bf16.msra.mxu1 %v2314_v52 }
 0x637   :  { %1792 = vmatprep.subr.bf16.mxu1 %v2317_v53 }
 0x63a   :  { %1794 = vmatpush1.bf16.msra.mxu1 %v2320_v60 }
 0x63b   :  { %1796 = vmatprep.subr.bf16.mxu1 %v2323_v61 }
 0x63e   :  { %1798 = vmatpush1.bf16.msra.mxu1 %v2326_v4 }
 0x63f   :  { %1800 = vmatprep.subr.bf16.mxu1 %v2329_v8 }
 0x642   :  { %1802 = vmatpush1.bf16.msra.mxu1 %v2333_v12 }
 0x643   :  { %1804 = vmatprep.subr.bf16.mxu1 %v2211_v24  ;;  %v1101_v24 = vld [vmem:[#allocation7 + $0x80] sm:$0xff] }
 0x6d8   :  { %v926_v9 = vpop.f32.mrb[10].mxu1 }
 0x6d9   :  { %v1917_v11 = vadd.f32 %v926_v9, %v2413_v39  ;;  %v928_v15 = vpop.f32.mrb[11].mxu1 }
 0x6da   :  { %v1918_v16 = vadd.f32 %v928_v15, %v2415_v40 }
 0x6dc   :  { %1963 = vtanh.f32 %v1918_v16 }
 0x6dd   :  { %1965 = vtanh.f32 %v1917_v11 }
 0x6e6   :  { %v1964_v17 = vpop.eup %1963 }
 0x6e7   :  { %v1966_v18 = vpop.eup %1965  ;;  %999 = vmatprep.mubr.f32.mxu1 %v1964_v17 }
 0x6e8   :  { %1000 = vmatmul.mubr.f32.vlgmr.msra.gmra.mrb[12].mxu1 %v1966_v18  ;;  %v1227_v18 = vld [vmem:[%s2624_s6] ss:$0 sm:$0xff] }
 0x6e9   :  { %1806 = vmatpush1.bf16.msra.mxu1 %v2222_v21  ;;  %v1102_v21 = vld [vmem:[#allocation7 + $0x88] sm:$0xff] }
 0x6ea   :  { %1808 = vmatprep.subr.bf16.mxu1 %v2227_v23  ;;  %v1085_v23 = vld [vmem:[#allocation7] sm:$0xff] }
 0x6ed   :  { %1810 = vmatpush1.bf16.msra.mxu1 %v2234_v33  ;;  %v1867_v33 = vpack.c.bf16 %v1102_v21, %v1101_v24 }
 0x6ee   :  { %1812 = vmatprep.subr.bf16.mxu1 %v2239_v34  ;;  %v1086_v34 = vld [vmem:[#allocation7 + $0x8] sm:$0xff] }
 0x6ef   :  { %1868 = vmatprep.subr.bf16.mxu0 %v1867_v33 }
 0x6f1   :  { %1814 = vmatpush1.bf16.msra.mxu1 %v2246_v42  ;;  %v1103_v42 = vld [vmem:[#allocation7 + $0x90] sm:$0xff] }
 0x6f2   :  { %1816 = vmatprep.subr.bf16.mxu1 %v2250_v43  ;;  %v1104_v43 = vld [vmem:[#allocation7 + $0x98] sm:$0xff] }
 0x6f5   :  { %1818 = vmatpush1.bf16.msra.mxu1 %v2256_v49  ;;  %v1869_v49 = vpack.c.bf16 %v1086_v34, %v1085_v23 }
 0x6f6   :  { %1820 = vmatprep.subr.bf16.mxu1 %v2259_v51  ;;  %v1871_v51 = vpack.c.bf16 %v1104_v43, %v1103_v42 }
 0x6f7   :  { %1870 = vmatpush3.bf16.msra.mxu0 %v1869_v49 }
 0x6f8   :  { %1872 = vmatprep.subr.bf16.mxu0 %v1871_v51 }
 0x6f9   :  { %1822 = vmatpush1.bf16.msra.mxu1 %v2265_v57  ;;  %v1087_v57 = vld [vmem:[#allocation7 + $0x10] sm:$0xff] }
 0x6fa   :  { %1824 = vmatprep.subr.bf16.mxu1 %v2269_v58  ;;  %v1088_v58 = vld [vmem:[#allocation7 + $0x18] sm:$0xff] }
 0x6fd   :  { %1826 = vmatpush1.bf16.msra.mxu1 %v2272_v63  ;;  %v1105_v63 = vld [vmem:[#allocation7 + $0xa0] sm:$0xff] }
 0x6fe   :  { %1828 = vmatprep.subr.bf16.mxu1 %v2275_v0  ;;  %v1106_v0 = vld [vmem:[#allocation7 + $0xa8] sm:$0xff] }
 0x701   :  { %1830 = vmatpush1.bf16.msra.mxu1 %v2278_v5  ;;  %v1873_v5 = vpack.c.bf16 %v1088_v58, %v1087_v57 }
 0x702   :  { %1832 = vmatprep.subr.bf16.mxu1 %v2281_v6  ;;  %v1875_v6 = vpack.c.bf16 %v1106_v0, %v1105_v63 }
 0x703   :  { %1874 = vmatpush3.bf16.msra.mxu0 %v1873_v5 }
 0x704   :  { %1876 = vmatprep.subr.bf16.mxu0 %v1875_v6 }
 0x705   :  { %1834 = vmatpush1.bf16.msra.mxu1 %v2284_v13  ;;  %v1089_v13 = vld [vmem:[#allocation7 + $0x20] sm:$0xff] }
 0x706   :  { %1836 = vmatprep.subr.bf16.mxu1 %v2287_v14  ;;  %v1090_v14 = vld [vmem:[#allocation7 + $0x28] sm:$0xff] }
 0x709   :  { %1838 = vmatpush1.bf16.msra.mxu1 %v2290_v19  ;;  %v1107_v19 = vld [vmem:[#allocation7 + $0xb0] sm:$0xff] }
 0x70a   :  { %1840 = vmatprep.subr.bf16.mxu1 %v2293_v20  ;;  %v1108_v20 = vld [vmem:[#allocation7 + $0xb8] sm:$0xff] }
 0x70d   :  { %1842 = vmatpush1.bf16.msra.mxu1 %v2296_v28  ;;  %v1877_v28 = vpack.c.bf16 %v1090_v14, %v1089_v13 }
 0x70e   :  { %1844 = vmatprep.subr.bf16.mxu1 %v2299_v29  ;;  %v1879_v29 = vpack.c.bf16 %v1108_v20, %v1107_v19 }
 0x70f   :  { %1878 = vmatpush3.bf16.msra.mxu0 %v1877_v28 }
 0x710   :  { %1880 = vmatprep.subr.bf16.mxu0 %v1879_v29 }
 0x711   :  { %1846 = vmatpush1.bf16.msra.mxu1 %v2302_v36  ;;  %v1091_v36 = vld [vmem:[#allocation7 + $0x30] sm:$0xff] }
 0x712   :  { %1848 = vmatprep.subr.bf16.mxu1 %v2305_v37  ;;  %v1092_v37 = vld [vmem:[#allocation7 + $0x38] sm:$0xff] }
 0x715   :  { %1850 = vmatpush1.bf16.msra.mxu1 %v2308_v44  ;;  %v1881_v44 = vpack.c.bf16 %v1092_v37, %v1091_v36 }
 0x716   :  { %1852 = vmatprep.subr.bf16.mxu1 %v2311_v45 }
 0x717   :  { %1882 = vmatpush3.bf16.msra.mxu0 %v1881_v44 }
 0x719   :  { %1854 = vmatpush1.bf16.msra.mxu1 %v2314_v52 }
 0x71a   :  { %1856 = vmatprep.subr.bf16.mxu1 %v2317_v53 }
 0x71d   :  { %1858 = vmatpush1.bf16.msra.mxu1 %v2320_v60 }
 0x71e   :  { %1860 = vmatprep.subr.bf16.mxu1 %v2323_v61 }
 0x721   :  { %1862 = vmatpush1.bf16.msra.mxu1 %v2326_v4 }
 0x722   :  { %1864 = vmatprep.subr.bf16.mxu1 %v2329_v8  ;;  %v1109_v8 = vld [vmem:[#allocation7 + $0xc0] sm:$0xff] }
 0x725   :  { %1866 = vmatpush1.bf16.msra.mxu1 %v2333_v12  ;;  %v1110_v12 = vld [vmem:[#allocation7 + $0xc8] sm:$0xff] }
 0x726   :  { %v1883_v22 = vpack.c.bf16 %v1110_v12, %v1109_v8 }
 0x728   :  { %1884 = vmatprep.subr.bf16.mxu0 %v1883_v22 }
 0x729   :  { %1886 = vmatpush3.bf16.msra.mxu0 %v1885_v27 }
 0x72a   :  { %1888 = vmatprep.subr.bf16.mxu0 %v1887_v31 }
 0x72d   :  { %1890 = vmatpush3.bf16.msra.mxu0 %v1889_v38 }
 0x72e   :  { %1892 = vmatprep.subr.bf16.mxu0 %v1891_v48 }
 0x731   :  { %1894 = vmatpush3.bf16.msra.mxu0 %v1893_v10 }
 0x732   :  { %1896 = vmatprep.subr.bf16.mxu0 %v1895_v56 }
 0x735   :  { %1898 = vmatpush3.bf16.msra.mxu0 %v1897_v1 }
 0x7bb   :  { %v1001_v45 = vpop.f32.mrb[12].mxu1 }
 0x7bc   :  { %v1919_v52 = vadd.f32 %v1001_v45, %v2413_v39  ;;  %v1003_v53 = vpop.f32.mrb[13].mxu1 }
 0x7bd   :  { %v1920_v60 = vadd.f32 %v1003_v53, %v2415_v40 }
 0x7bf   :  { %1967 = vtanh.f32 %v1920_v60 }
 0x7c0   :  { %1969 = vtanh.f32 %v1919_v52 }
 0x7c9   :  { %v1968_v61 = vpop.eup %1967 }
 0x7ca   :  { %v1970_v4 = vpop.eup %1969  ;;  %1074 = vmatprep.mubr.f32.mxu1 %v1968_v61 }
 0x7cb   :  { %1075 = vmatmul.mubr.f32.vlgmr.msra.gmra.mrb[14].mxu1 %v1970_v4 }
 0x89e   :  { %v1076_v2 = vpop.f32.mrb[14].mxu1 }
 0x89f   :  { %v1921_v3 = vadd.f32 %v1076_v2, %v2413_v39  ;;  %v1078_v9 = vpop.f32.mrb[15].mxu1 }
 0x8a0   :  { %v1922_v11 = vadd.f32 %v1078_v9, %v2415_v40 }
 0x8a2   :  { %1971 = vtanh.f32 %v1922_v11 }
 0x8a3   :  { %1973 = vtanh.f32 %v1921_v3 }
 0x8ac   :  { %v1972_v15 = vpop.eup %1971 }
 0x8ad   :  { %v1974_v16 = vpop.eup %1973  ;;  %1188 = vmatprep.mubr.f32.mxu0 %v1972_v15 }
 0x8ae   :  { %1189 = vmatmul.mubr.f32.vlgmr.msra.gmra.mrb[16].mxu0 %v1974_v16 }
 0x981   :  { %v1276_v17 = vpop.f32.mrb[16].mxu0 }
 0x982   :  { %v1277_v24 = vpop.f32.mrb[17].mxu0 }
 0x983   :  { %v1278_v21 = vadd.f32 %v1277_v24, %v1276_v17 }
 0x985   :  { %v1191_v23 = vadd.f32 %v1278_v21, %v1227_v18 }
 0x987   :  { %1194 = vst [vmem:[#allocation8] sm:$0xff] %v1191_v23 }
 0x988   :  { %2052 = shalt.err (!%p2049_p0)
}
 0x989   :  { %s2053_s26 = scalar_lea.hbm %s2625_s7, 128 }
 0x98a   :  { %p2054_p1 = scmp.ne.s32.totalorder %s2625_s7, %s2053_s26  ;;  %p2057_p2 = scmp.lt.u32.totalorder %s2053_s26, %s2625_s7 }
 0x98c   :  { %p2059_p3 = pnand %p2057_p2, %p2054_p1 }
 0x98e   :  { %2062 = shalt.err (!%p2059_p3)
}
 0x98f   :  { %1204 = dma.vmem_to_hbm [thread:$0]  %s1202_s23, 128, %s2625_s7, [#allocation4]  }
 0x990   :  { %2067 = dma.done.wait [#allocation4], 128  }
 0x991   :  { %2068 = vsyncadd [#allocation4], 4294967168 }
 0x992   :  { %1208 = vsyncpa [#allocation3], 1 }
 0x993   :  { %1209 = vsyncpa [#allocation6], 1 }
 0x994   :  { %1210 = vsyncpa [#allocation4], 1 }

</bundles_post_ra>
